<compile_context>
chip_gen: v7x
topology: tpu7x:2x2x1
jax: 0.10.0
libtpu: 0.0.40
codegen_flags: <defaults>
</compile_context>

<pallas_src>
import jax
import jax.numpy as jnp
from jax.experimental import pallas as pl
from jax.experimental.pallas import tpu as pltpu

Dim_capsule = 16
Num_capsule = 10
dropout_p = 0.25  # inference mode -> identity

D_IN = Num_capsule * Dim_capsule  # 160


def _round_up(x, m):
    return ((x + m - 1) // m) * m


def dense_sigmoid_kernel(x_ref, w_ref, b_ref, o_ref):
    # x_ref: (tb, D_in)  [streamed per batch tile]
    # w_ref: (D_in, D_out), b_ref: (1, D_out)  [VMEM-resident across tiles]
    # o_ref: (tb, D_out)
    y = jnp.dot(x_ref[...], w_ref[...], preferred_element_type=jnp.float32)
    y = y + b_ref[...]                      # bias kept in f32
    o_ref[...] = jax.nn.sigmoid(y).astype(o_ref.dtype)


def dense_layer_forward(x, w_t, b, *, target_tb=1024, use_bf16=None):
    """x:   (B, Num_capsule, Dim_capsule) float32
       w_t: (D_in, D_out) float32  (transposed torch weight)
       b:   (D_out,) float32
    Returns (B, D_out) float32 == sigmoid(x.view(B,-1) @ w_t + b)  (eval-mode dropout).
    """
    B = x.shape[0]
    d_in, d_out = w_t.shape
    x_flat = x.reshape(B, -1)  # == torch x.view(batch, -1); Dropout is identity in eval()

    # bf16 activations for large-batch inference (halves the dominant HBM read stream);
    # small batches stay f32 to match the reference bit-tightly.
    if use_bf16 is None:
        use_bf16 = B >= 512
    in_dtype = jnp.bfloat16 if use_bf16 else jnp.float32

    x_in = x_flat.astype(in_dtype)
    w_in = w_t.astype(in_dtype)
    b_in = b.reshape(1, d_out).astype(jnp.float32)

    # --- batch tiling: waste-bounded tile size, no wrapper-side padding -------------------
    if B <= target_tb:
        tb = B                      # single tile; block dim == full array dim is legal
    else:
        n_tiles = pl.cdiv(B, target_tb)           # >= 2  -> feeds both TCs on v7x
        tb = _round_up(pl.cdiv(B, n_tiles), 8)    # multiple of 8; boundary tile is masked
    grid = (pl.cdiv(B, tb),)

    out = pl.pallas_call(
        dense_sigmoid_kernel,
        out_shape=jax.ShapeDtypeStruct((B, d_out), jnp.float32),
        grid=grid,
        in_specs=[
            # activations: streamed / double-buffered per batch tile (last dim = full 160)
            pl.BlockSpec((tb, d_in), lambda i: (i, 0)),
            # weight + bias: constant block index -> VMEM-resident, no re-DMA per tile
            pl.BlockSpec((d_in, d_out), lambda i: (0, 0)),
            pl.BlockSpec((1, d_out), lambda i: (0, 0)),
        ],
        out_specs=pl.BlockSpec((tb, d_out), lambda i: (i, 0)),
        compiler_params=pltpu.CompilerParams(
            dimension_semantics=("parallel",)),  # shards batch tiles across TCs on v7x
    )(x_in, w_in, b_in)

    return out


if __name__ == "__main__":
    output_dim = 32
    d_in = Num_capsule * Dim_capsule  # 160

    key = jax.random.PRNGKey(0)
    kx, kw, kb = jax.random.split(key, 3)

    # deterministic parameter init (torch nn.Linear-style uniform bound)
    bound = 1.0 / (d_in ** 0.5)
    W = jax.random.uniform(kw, (output_dim, d_in), jnp.float32, -bound, bound)
    b = jax.random.uniform(kb, (output_dim,), jnp.float32, -bound, bound)
    W_t = W.T  # (d_in, d_out)

    # --- small batch (B=2): single tile, f32 path, bit-tight check ------------------------
    B = 2
    x = jax.random.normal(kx, (B, Num_capsule, Dim_capsule), jnp.float32)
    out = jax.block_until_ready(dense_layer_forward(x, W_t, b))
    ref = jax.nn.sigmoid(x.reshape(B, -1) @ W_t + b[None, :])
    assert out.shape == (B, output_dim)
    assert jnp.allclose(out, ref, atol=1e-5, rtol=1e-5)

    # --- large batch (B=1200): 2 tiles of 600 rows, no padding waste, f32 tight check -----
    kx2 = jax.random.fold_in(kx, 1)
    x_big = jax.random.normal(kx2, (1200, Num_capsule, Dim_capsule), jnp.float32)
    out_big = jax.block_until_ready(dense_layer_forward(x_big, W_t, b, use_bf16=False))
    ref_big = jax.nn.sigmoid(x_big.reshape(1200, -1) @ W_t + b[None, :])
    assert out_big.shape == (1200, output_dim)
    assert jnp.allclose(out_big, ref_big, atol=1e-5, rtol=1e-5)

    # --- large batch, default bf16 activation path (looser tolerance) ---------------------
    out_bf16 = jax.block_until_ready(dense_layer_forward(x_big, W_t, b))  # auto bf16
    assert jnp.allclose(out_bf16, ref_big, atol=2e-2, rtol=2e-2)

    # --- non-multiple-of-8 batch (B=1001): exercises the masked boundary tile -------------
    kx3 = jax.random.fold_in(kx, 2)
    x_odd = jax.random.normal(kx3, (1001, Num_capsule, Dim_capsule), jnp.float32)
    out_odd = jax.block_until_ready(dense_layer_forward(x_odd, W_t, b, use_bf16=False))
    ref_odd = jax.nn.sigmoid(x_odd.reshape(1001, -1) @ W_t + b[None, :])
    assert out_odd.shape == (1001, output_dim)
    assert jnp.allclose(out_odd, ref_odd, atol=1e-5, rtol=1e-5)

    print("KERNEL_OK")
</pallas_src>

<mosaic_0001>
module attributes {stable_mosaic.version = 11 : i64} {
  func.func @dense_sigmoid_kernel(%arg0: i32, %arg1: memref<2x160xf32, #tpu.memory_space<vmem>>, %arg2: memref<160x32xf32, #tpu.memory_space<vmem>>, %arg3: memref<1x32xf32, #tpu.memory_space<vmem>>, %arg4: memref<2x32xf32, #tpu.memory_space<vmem>>) attributes {dimension_semantics = [#tpu.dimension_semantics<parallel>], iteration_bounds = array<i64: 1>, scalar_prefetch = 0 : i64, scratch_operands = 0 : i64, tpu.core_type = #tpu.core_type<tc>, window_params = [{transform_indices = @transform_0, window_bounds = array<i64: 2, 160>}, {pipeline_mode = #tpu.pipeline_mode<synchronous>, transform_indices = @transform_1, window_bounds = array<i64: 160, 32>}, {pipeline_mode = #tpu.pipeline_mode<synchronous>, transform_indices = @transform_2, window_bounds = array<i64: 1, 32>}, {transform_indices = @transform_3, window_bounds = array<i64: 2, 32>}]} {
    %c0 = arith.constant 0 : index
    %c0_0 = arith.constant 0 : index
    %0 = vector.load %arg1[%c0, %c0_0] : memref<2x160xf32, #tpu.memory_space<vmem>>, vector<2x160xf32>
    %c0_1 = arith.constant 0 : index
    %c0_2 = arith.constant 0 : index
    %1 = vector.load %arg2[%c0_1, %c0_2] : memref<160x32xf32, #tpu.memory_space<vmem>>, vector<160x32xf32>
    %cst = arith.constant dense<0.000000e+00> : vector<2x32xf32>
    %2 = tpu.matmul %0, %1, %cst {dimension_numbers = #tpu.dot_dimension_numbers<[1], [0], [0], [1], [0, 0, 1, 1], [], []>} : vector<2x160xf32>, vector<160x32xf32>, vector<2x32xf32> -> vector<2x32xf32>
    %c0_3 = arith.constant 0 : index
    %c0_4 = arith.constant 0 : index
    %3 = vector.load %arg3[%c0_3, %c0_4] : memref<1x32xf32, #tpu.memory_space<vmem>>, vector<1x32xf32>
    %4 = vector.broadcast %3 : vector<1x32xf32> to vector<2x32xf32>
    %5 = arith.addf %2, %4 : vector<2x32xf32>
    %6 = arith.negf %5 : vector<2x32xf32>
    %7 = math.exp %6 : vector<2x32xf32>
    %cst_5 = arith.constant 1.000000e+00 : f32
    %8 = vector.broadcast %cst_5 : f32 to vector<2x32xf32>
    %9 = arith.addf %8, %7 : vector<2x32xf32>
    %10 = arith.divf %8, %9 : vector<2x32xf32>
    %c0_6 = arith.constant 0 : index
    %c0_7 = arith.constant 0 : index
    %11 = vector.load %arg4[%c0_6, %c0_7] : memref<2x32xf32, #tpu.memory_space<vmem>>, vector<2x32xf32>
    tpu.vector_store %arg4[%c0_6, %c0_7], %10 {strides = array<i32>} : memref<2x32xf32, #tpu.memory_space<vmem>>, vector<2x32xf32>,
    return
  }
  func.func @transform_0(%arg0: i32) -> (i32, i32) {
    %c0_i32 = arith.constant 0 : i32
    %c0_i32_0 = arith.constant 0 : i32
    return %arg0, %c0_i32 : i32, i32
  }
  func.func @transform_1(%arg0: i32) -> (i32, i32) {
    %c0_i32 = arith.constant 0 : i32
    %c0_i32_0 = arith.constant 0 : i32
    %c0_i32_1 = arith.constant 0 : i32
    return %c0_i32, %c0_i32_0 : i32, i32
  }
  func.func @transform_2(%arg0: i32) -> (i32, i32) {
    %c0_i32 = arith.constant 0 : i32
    %c0_i32_0 = arith.constant 0 : i32
    %c0_i32_1 = arith.constant 0 : i32
    return %c0_i32, %c0_i32_0 : i32, i32
  }
  func.func @transform_3(%arg0: i32) -> (i32, i32) {
    %c0_i32 = arith.constant 0 : i32
    %c0_i32_0 = arith.constant 0 : i32
    return %arg0, %c0_i32 : i32, i32
  }
}

</mosaic_0001>

<bundles_post_ra>
// kernel: tpu_custom_call.1
= control target key start
LH: loop header
LB: loop body
LE: loop exit
PB: predicated region body
PF: predicated region fallthrough
CT: control target
= control target key end

     0   :  { %v212_v3 = vmov 0.0|0.0   ;;  %vm53_vm0 = vcmask 261120   ;;  %s312_s0 = inlined_call_operand.vmem [shape: f32[2,160], index: 0, kind: input, shape index: {}]   ;;  %s313_s1 = inlined_call_operand.vmem [shape: f32[160,32], index: 1, kind: input, shape index: {}]   ;;  %s314_s2 = inlined_call_operand.vmem [shape: f32[1,32], index: 2, kind: input, shape index: {}]   ;;  %s315_s3 = inlined_call_operand.hbm [shape: f32[2,32], index: 3, kind: output, shape index: {}]  }
   0x1   :  { %v16_v0 = vld [vmem:[%s313_s1] sm:$0xff]  ;;  %v17_v1 = vld [vmem:[%s313_s1 + $0x8] sm:$0xff]  ;;  %v18_v2 = vld [vmem:[%s313_s1 + $0x10] sm:$0xff]  ;;  %152 = vmatprep.subr.bf16.mxu0 %v212_v3 }
   0x2   :  { %v153_v4 = vpack.c.bf16 %v17_v1, %v16_v0  ;;  %v19_v5 = vld [vmem:[%s313_s1 + $0x18] sm:$0xff]  ;;  %v20_v7 = vld [vmem:[%s313_s1 + $0x20] sm:$0xff]  ;;  %v21_v8 = vld [vmem:[%s313_s1 + $0x28] sm:$0xff] }
   0x3   :  { %v156_v6 = vpack.c.bf16 %v19_v5, %v18_v2  ;;  %v149_v9 = vld.sshfl [vmem:[%s312_s0] sm:$0x33 pattern:$0x76325410]  ;;  %v159_v10 = vpack.c.bf16 %v21_v8, %v20_v7 }
   0x4   :  { %154 = vmatpush1.bf16.msra.mxu0 %v153_v4  ;;  %v51_v11 = vcombine.high %v149_v9, %v149_v9 }
   0x5   :  { %155 = vmatprep.subr.bf16.mxu0 %v212_v3 }
   0x8   :  { %157 = vmatpush1.bf16.msra.mxu0 %v156_v6 }
   0x9   :  { %8 = vsyncpa [#allocation3], 0  ;;  %158 = vmatprep.subr.bf16.mxu0 %v212_v3  ;;  %v22_v12 = vld [vmem:[%s313_s1 + $0x30] sm:$0xff]  ;;  %v23_v13 = vld [vmem:[%s313_s1 + $0x38] sm:$0xff]  ;;  %150 = vmatprep.mubr.msk.f32.mxu0 %vm53_vm0, %v51_v11  ;;  %s213_s28 = smov [#allocation2]   ;;  %vm132_vm1 = vcmask 254976  }
   0xa   :  { %v162_v14 = vpack.c.bf16 %v23_v13, %v22_v12  ;;  %v24_v15 = vld [vmem:[%s313_s1 + $0x40] sm:$0xff]  ;;  %v25_v16 = vld [vmem:[%s313_s1 + $0x48] sm:$0xff]  ;;  %v26_v18 = vld [vmem:[%s313_s1 + $0x50] sm:$0xff]  ;;  %s140_s29 = sshll.u32 %s213_s28, 4  ;;  %s141_s29 = int_to_ptr.vmem [resolvable:$true] %s140_s29 }
   0xb   :  { %v165_v17 = vpack.c.bf16 %v25_v16, %v24_v15  ;;  %v27_v19 = vld [vmem:[%s313_s1 + $0x58] sm:$0xff]  ;;  %v28_v21 = vld [vmem:[%s313_s1 + $0x60] sm:$0xff]  ;;  %v29_v22 = vld [vmem:[%s313_s1 + $0x68] sm:$0xff]  ;;  %p193_p1 = scmp.lt.s32.totalorder %s141_s29, %s141_s29 }
   0xc   :  { %160 = vmatpush1.bf16.msra.mxu0 %v159_v10  ;;  %v168_v20 = vpack.c.bf16 %v27_v19, %v26_v18  ;;  %v171_v23 = vpack.c.bf16 %v29_v22, %v28_v21  ;;  %v30_v24 = vld [vmem:[%s313_s1 + $0x70] sm:$0xff]  ;;  %v31_v25 = vld [vmem:[%s313_s1 + $0x78] sm:$0xff]  ;;  %v32_v27 = vld [vmem:[%s313_s1 + $0x80] sm:$0xff] }
   0xd   :  { %161 = vmatprep.subr.bf16.mxu0 %v212_v3  ;;  %v174_v26 = vpack.c.bf16 %v31_v25, %v30_v24  ;;  %v33_v28 = vld [vmem:[%s313_s1 + $0x88] sm:$0xff]  ;;  %v34_v30 = vld [vmem:[%s313_s1 + $0x90] sm:$0xff]  ;;  %v35_v31 = vld [vmem:[%s313_s1 + $0x98] sm:$0xff]  ;;  %s188_s1 = scalar_lea.vmem %s141_s29, 32 }
   0xe   :  { %v177_v29 = vpack.c.bf16 %v33_v28, %v32_v27  ;;  %v180_v32 = vpack.c.bf16 %v35_v31, %v34_v30  ;;  %v148_v33 = vld [vmem:[%s314_s2] ss:$0 sm:$0xff]  ;;  %p189_p0 = scmp.ne.s32.totalorder %s141_s29, %s188_s1  ;;  %p194_p2 = scmp.lt.s32.totalorder %s188_s1, %s188_s1 }
  0x10   :  { %163 = vmatpush1.bf16.msra.mxu0 %v162_v14  ;;  %p195_p3 = por %p194_p2, %p193_p1 }
  0x11   :  { %164 = vmatprep.subr.bf16.mxu0 %v212_v3 }
  0x12   :  { %p196_p4 = pnand %p195_p3, %p189_p0 }
  0x14   :  { %166 = vmatpush1.bf16.msra.mxu0 %v165_v17 }
  0x15   :  { %167 = vmatprep.subr.bf16.mxu0 %v212_v3 }
  0x18   :  { %169 = vmatpush1.bf16.msra.mxu0 %v168_v20 }
  0x19   :  { %170 = vmatprep.subr.bf16.mxu0 %v212_v3 }
  0x1c   :  { %172 = vmatpush1.bf16.msra.mxu0 %v171_v23 }
  0x1d   :  { %173 = vmatprep.subr.bf16.mxu0 %v212_v3 }
  0x20   :  { %175 = vmatpush1.bf16.msra.mxu0 %v174_v26 }
  0x21   :  { %176 = vmatprep.subr.bf16.mxu0 %v212_v3 }
  0x24   :  { %178 = vmatpush1.bf16.msra.mxu0 %v177_v29 }
  0x25   :  { %179 = vmatprep.subr.bf16.mxu0 %v212_v3 }
  0x28   :  { %181 = vmatpush1.bf16.msra.mxu0 %v180_v32 }
  0x2b   :  { %121 = vmatmul.mubr.f32.vlgmr.msra.gmra.mrb[0].mxu0 %v149_v9 }
  0xfe   :  { %v122_v34 = vpop.f32.mrb[0].mxu0 }
  0xff   :  { %v123_v35 = vadd.f32 %v148_v33, %v122_v34  ;;  %v124_v36 = vpop.f32.mrb[1].mxu0 }
 0x101   :  { %v151_v37 = vmul.f32 -1.442695, %v123_v35 }
 0x103   :  { %184 = vpow2.f32 %v151_v37 }
 0x10d   :  { %v185_v38 = vpop.eup %184 }
 0x10e   :  { %v129_v39 = vadd.f32 1.0, %v185_v38 }
 0x110   :  { %186 = vrcp.f32 %v129_v39 }
 0x11a   :  { %v187_v40 = vpop.eup %186 }
 0x11b   :  { %133 = vst.msk [vmem:[#allocation2] sm:$0x3] %vm132_vm1, %v187_v40 }
 0x11c   :  { %199 = shalt.err (!%p196_p4)
}
 0x11d   :  { %s200_s0 = scalar_lea.hbm %s315_s3, 32 }
 0x11e   :  { %p201_p5 = scmp.ne.s32.totalorder %s315_s3, %s200_s0  ;;  %p204_p6 = scmp.lt.u32.totalorder %s200_s0, %s315_s3 }
 0x120   :  { %p206_p7 = pnand %p204_p6, %p201_p5 }
 0x122   :  { %209 = shalt.err (!%p206_p7)
}
 0x123   :  { %143 = dma.vmem_to_hbm [thread:$0]  %s141_s29, 32, %s315_s3, [#allocation3]  }
 0x124   :  { %210 = dma.done.wait [#allocation3], 32  }
 0x125   :  { %211 = vsyncadd [#allocation3], 4294967264 }
 0x126   :  { %147 = vsyncpa [#allocation3], 1 }

</bundles_post_ra>
